<compile_context>
chip_gen: v6e
topology: v6e:2x2x1
jax: 0.10.0
libtpu: 0.0.40
codegen_flags: <defaults>
</compile_context>

<pallas_src>
import functools

import jax
import jax.numpy as jnp
from jax.experimental import pallas as pl
from jax.experimental.pallas import tpu as pltpu


def _fused_cconv2_kernel(x_ref, w1_ref, w2_ref, o_ref, *, N, W, Lh, Kh, Kw, dh, dw):
    """Fused ComplexConv2 forward for the whole (tiny) batch in one step.

    x_ref : (N, 2*Cin, Hp*W)       stacked [real; imag] channels, H zero-padded so that the
                                   H-pass output width per element is Lh = H*W (lane-dense)
    w1_ref: (2*C1, Kh*2*Cin + 1)   combined H-pass weights; bias [br-bi; br+bi] in last column
    w2_ref: (2*C2, Kw*2*C1 + 1)    combined W-pass weights; bias folded the same way
    o_ref : (N, 2*C2, Lh)          fused (h, w) on lanes; rows h >= Hout and the last
                                   (Kw-1)*dw columns of each row are junk, sliced off on host
    """
    ones = jnp.ones((1, N * Lh), jnp.float32)          # constant row for the folded bias

    # ---- pass 1: complex conv along H ------------------------------------------------------
    # Per-element tap windows (no window crosses a batch boundary), concatenated on lanes so
    # the matmul RHS is N*Lh = 512 lanes wide; taps stacked on sublanes (one wide MXU matmul).
    xs = [x_ref[n] for n in range(N)]                  # each (2*Cin, Hp*W)
    xcol1 = jnp.concatenate(
        [jnp.concatenate([xn[:, k * dh * W: k * dh * W + Lh] for xn in xs], axis=1)
         for k in range(Kh)] + [ones], axis=0)         # (Kh*2Cin + 1, N*Lh)
    y1 = jnp.dot(w1_ref[...], xcol1,
                 preferred_element_type=jnp.float32)   # (2*C1, N*Lh)

    # ---- pass 2: complex conv along W ------------------------------------------------------
    # Append a small zero tail in-register so the last tap window never reads out of bounds;
    # windows that straddle an element boundary only ever feed junk output columns.
    padw = (Kw - 1) * dw
    if padw:
        y1 = jnp.concatenate(
            [y1, jnp.zeros((y1.shape[0], padw), jnp.float32)], axis=1)
    xcol2 = jnp.concatenate(
        [y1[:, k * dw: k * dw + N * Lh] for k in range(Kw)] + [ones],
        axis=0)                                        # (Kw*2C1 + 1, N*Lh)
    y2 = jnp.dot(w2_ref[...], xcol2,
                 preferred_element_type=jnp.float32)   # (2*C2, N*Lh)

    for n in range(N):                                 # lane-dense (2*C2, Lh) stores
        o_ref[n] = y2[:, n * Lh:(n + 1) * Lh]


def _combine_complex_conv1d(wr, wi, br, bi):
    """Fold a ComplexConv1d into one real conv over stacked [real; imag] channels.

    wr, wi: (Cout, Cin, K) PyTorch Conv1d weights;  br, bi: (Cout,)
    Returns (2*Cout, K*2*Cin + 1): columns ordered (tap, channel), combined bias
    [br - bi ; br + bi] appended as the last column (multiplies a constant-1 row).
    """
    Cout, Cin, K = wr.shape
    top = jnp.concatenate([wr, -wi], axis=1)           # rows producing the real output
    bot = jnp.concatenate([wi, wr], axis=1)            # rows producing the imag output
    wc = jnp.concatenate([top, bot], axis=0)           # (2*Cout, 2*Cin, K)
    wcol = jnp.transpose(wc, (0, 2, 1)).reshape(2 * Cout, K * 2 * Cin)
    bcol = jnp.concatenate([br - bi, br + bi]).reshape(2 * Cout, 1)
    return jnp.concatenate([wcol, bcol], axis=1)


def complex_conv2_forward(Xr, Xi, params):
    """ComplexConv2.forward: NCHW real/imag in -> NCHW real/imag out, one fused Pallas kernel."""
    N, C, H, W = Xr.shape
    ph, pw = params["h"], params["w"]
    # TODO(synk): stride != 1, padding != 0 and groups != 1 are not implemented (module defaults).
    for p in (ph, pw):
        assert p["stride"] == 1 and p["padding"] == 0, "only stride=1, padding=0 supported"

    Kh, dh = ph["wr"].shape[-1], ph["dilation"]
    Kw, dw = pw["wr"].shape[-1], pw["dilation"]
    C1 = ph["wr"].shape[0]                             # convh out_channels
    C2 = pw["wr"].shape[0]                             # convw out_channels
    assert ph["wr"].shape[1] == C
    assert pw["wr"].shape[1] == C1, "ComplexConv2 stacking requires out_channels == in_channels"

    Hout = H - dh * (Kh - 1)
    Wout = W - dw * (Kw - 1)
    pad_h = dh * (Kh - 1)                              # host-side zero rows -> lane-dense width
    Hp = H + pad_h
    Lh = H * W                                         # fused (h, w) width per element (= 256)

    w1 = _combine_complex_conv1d(ph["wr"], ph["wi"], ph["br"], ph["bi"])
    w2 = _combine_complex_conv1d(pw["wr"], pw["wi"], pw["br"], pw["bi"])

    # Stack [real; imag] channels, zero-pad H, fuse (H, W) onto lanes: (N, 2C, Hp*W).
    x = jnp.concatenate([Xr, Xi], axis=1)
    if pad_h:
        x = jnp.pad(x, ((0, 0), (0, 0), (0, pad_h), (0, 0)))
    x = x.reshape(N, 2 * C, Hp * W)

    kernel = functools.partial(_fused_cconv2_kernel,
                               N=N, W=W, Lh=Lh, Kh=Kh, Kw=Kw, dh=dh, dw=dw)
    out = pl.pallas_call(
        kernel,
        grid=(1,),                                     # whole batch in one step (no per-step
        in_specs=[                                     # pipeline overhead at this tiny size)
            pl.BlockSpec((N, 2 * C, Hp * W), lambda i: (0, 0, 0)),
            pl.BlockSpec((2 * C1, Kh * 2 * C + 1), lambda i: (0, 0)),
            pl.BlockSpec((2 * C2, Kw * 2 * C1 + 1), lambda i: (0, 0)),
        ],
        out_specs=pl.BlockSpec((N, 2 * C2, Lh), lambda i: (0, 0, 0)),
        out_shape=jax.ShapeDtypeStruct((N, 2 * C2, Lh), jnp.float32),
        compiler_params=pltpu.CompilerParams(
            dimension_semantics=("arbitrary",)),
    )(x, w1, w2)

    # (N, 2*C2, H*W) -> (N, 2*C2, H, W) -> drop junk rows/cols -> split real / imag (NCHW).
    out = out.reshape(N, 2 * C2, H, W)[:, :, :Hout, :Wout]
    return out[:, :C2], out[:, C2:]


# ----------------------------- pure-JAX reference (for self-check) -----------------------------

def _ref_complex_conv1d(xr, xi, wr, wi, br, bi, dilation):
    """ComplexConv1d on PyTorch (M, Cin, L) layout, conv (cross-correlation) along last axis."""
    K = wr.shape[-1]
    Lout = xr.shape[-1] - dilation * (K - 1)

    def conv(x, w, b):
        acc = sum(jnp.einsum("mcl,oc->mol",
                             x[:, :, k * dilation: k * dilation + Lout], w[:, :, k])
                  for k in range(K))
        return acc + b[None, :, None]

    return (conv(xr, wr, br) - conv(xi, wi, bi),
            conv(xi, wr, br) + conv(xr, wi, bi))


def _ref_complex_conv2(Xr, Xi, params):
    """Pure-JAX mirror of the PyTorch ComplexConv2.forward permute/view/conv sequence."""
    N, C, H, W = Xr.shape
    ph = params["h"]
    xr = jnp.transpose(Xr, (0, 3, 1, 2)).reshape(N * W, C, H)
    xi = jnp.transpose(Xi, (0, 3, 1, 2)).reshape(N * W, C, H)
    yr, yi = _ref_complex_conv1d(xr, xi, ph["wr"], ph["wi"], ph["br"], ph["bi"], ph["dilation"])
    Co, Ho = yr.shape[1], yr.shape[2]
    Xr2 = jnp.transpose(yr.reshape(N, W, Co, Ho), (0, 2, 3, 1))
    Xi2 = jnp.transpose(yi.reshape(N, W, Co, Ho), (0, 2, 3, 1))

    pw = params["w"]
    N2, C2, H2, W2 = Xr2.shape
    xr = jnp.transpose(Xr2, (0, 2, 1, 3)).reshape(N2 * H2, C2, W2)
    xi = jnp.transpose(Xi2, (0, 2, 1, 3)).reshape(N2 * H2, C2, W2)
    yr, yi = _ref_complex_conv1d(xr, xi, pw["wr"], pw["wi"], pw["br"], pw["bi"], pw["dilation"])
    Co2, Wo = yr.shape[1], yr.shape[2]
    Yr = jnp.transpose(yr.reshape(N2, H2, Co2, Wo), (0, 2, 1, 3))
    Yi = jnp.transpose(yi.reshape(N2, H2, Co2, Wo), (0, 2, 1, 3))
    return Yr, Yi


# ------------------------------------- parameter helpers --------------------------------------

def init_params(key, in_channels, out_channels, kernel_size=(3, 3),
                stride=(1, 1), padding=(0, 0), dilation=(1, 1)):
    """Deterministic synthetic params in PyTorch Conv1d layout: weights (Cout, Cin, K)."""
    kh, kw = kernel_size
    ks = jax.random.split(key, 8)

    def branch(subkeys, K, s, p, d):
        k_wr, k_wi, k_br, k_bi = subkeys
        return dict(
            wr=0.2 * jax.random.normal(k_wr, (out_channels, in_channels, K), jnp.float32),
            wi=0.2 * jax.random.normal(k_wi, (out_channels, in_channels, K), jnp.float32),
            br=0.1 * jax.random.normal(k_br, (out_channels,), jnp.float32),
            bi=0.1 * jax.random.normal(k_bi, (out_channels,), jnp.float32),
            stride=s, padding=p, dilation=d)

    return dict(h=branch(ks[0:4], kh, stride[0], padding[0], dilation[0]),
                w=branch(ks[4:8], kw, stride[1], padding[1], dilation[1]))


if __name__ == "__main__":
    key = jax.random.PRNGKey(0)
    k_x, k_p = jax.random.split(key)

    N, Cin, H, W = 2, 4, 16, 16
    Cout = Cin  # required by the PyTorch module for the stacked forward to be valid

    kx_r, kx_i = jax.random.split(k_x)
    Xr = jax.random.normal(kx_r, (N, Cin, H, W), jnp.float32)
    Xi = jax.random.normal(kx_i, (N, Cin, H, W), jnp.float32)

    params = init_params(k_p, Cin, Cout, kernel_size=(3, 3),
                         stride=(1, 1), padding=(0, 0), dilation=(1, 1))

    Yr, Yi = complex_conv2_forward(Xr, Xi, params)
    (Yr, Yi) = jax.block_until_ready((Yr, Yi))

    # self-check against a pure-JAX reference of the PyTorch forward
    Rr, Ri = _ref_complex_conv2(Xr, Xi, params)
    assert Yr.shape == (N, Cout, H - 2, W - 2), Yr.shape
    assert Yi.shape == (N, Cout, H - 2, W - 2), Yi.shape
    assert jnp.allclose(Yr, Rr, rtol=1e-3, atol=1e-3)
    assert jnp.allclose(Yi, Ri, rtol=1e-3, atol=1e-3)

    print("KERNEL_OK")
</pallas_src>

<mosaic_0001>
module attributes {stable_mosaic.version = 11 : i64} {
  func.func @_fused_cconv2_kernel(%arg0: i32, %arg1: memref<2x8x288xf32, #tpu.memory_space<vmem>>, %arg2: memref<8x25xf32, #tpu.memory_space<vmem>>, %arg3: memref<8x25xf32, #tpu.memory_space<vmem>>, %arg4: memref<2x8x256xf32, #tpu.memory_space<vmem>>) attributes {dimension_semantics = [#tpu.dimension_semantics<arbitrary>], iteration_bounds = array<i64: 1>, scalar_prefetch = 0 : i64, scratch_operands = 0 : i64, tpu.core_type = #tpu.core_type<tc>, window_params = [{pipeline_mode = #tpu.pipeline_mode<synchronous>, transform_indices = @transform_0, window_bounds = array<i64: 2, 8, 288>}, {pipeline_mode = #tpu.pipeline_mode<synchronous>, transform_indices = @transform_1, window_bounds = array<i64: 8, 25>}, {pipeline_mode = #tpu.pipeline_mode<synchronous>, transform_indices = @transform_2, window_bounds = array<i64: 8, 25>}, {pipeline_mode = #tpu.pipeline_mode<synchronous>, transform_indices = @transform_3, window_bounds = array<i64: 2, 8, 256>}]} {
    %cst = arith.constant 1.000000e+00 : f32
    %0 = vector.broadcast %cst : f32 to vector<1x512xf32>
    %c0 = arith.constant 0 : index
    %c0_0 = arith.constant 0 : index
    %c0_1 = arith.constant 0 : index
    %1 = vector.load %arg1[%c0, %c0_0, %c0_1] : memref<2x8x288xf32, #tpu.memory_space<vmem>>, vector<1x8x288xf32>
    %2 = vector.shape_cast %1 : vector<1x8x288xf32> to vector<8x288xf32>
    %c1 = arith.constant 1 : index
    %c0_2 = arith.constant 0 : index
    %c0_3 = arith.constant 0 : index
    %3 = vector.load %arg1[%c1, %c0_2, %c0_3] : memref<2x8x288xf32, #tpu.memory_space<vmem>>, vector<1x8x288xf32>
    %4 = vector.shape_cast %3 : vector<1x8x288xf32> to vector<8x288xf32>
    %5 = vector.extract_strided_slice %2 {offsets = [0, 0], sizes = [8, 256], strides = [1, 1]} : vector<8x288xf32> to vector<8x256xf32>
    %6 = vector.extract_strided_slice %4 {offsets = [0, 0], sizes = [8, 256], strides = [1, 1]} : vector<8x288xf32> to vector<8x256xf32>
    %7 = tpu.concatenate %5, %6 in 1 : vector<8x256xf32>, vector<8x256xf32> -> vector<8x512xf32>
    %8 = vector.extract_strided_slice %2 {offsets = [0, 16], sizes = [8, 256], strides = [1, 1]} : vector<8x288xf32> to vector<8x256xf32>
    %9 = vector.extract_strided_slice %4 {offsets = [0, 16], sizes = [8, 256], strides = [1, 1]} : vector<8x288xf32> to vector<8x256xf32>
    %10 = tpu.concatenate %8, %9 in 1 : vector<8x256xf32>, vector<8x256xf32> -> vector<8x512xf32>
    %11 = vector.extract_strided_slice %2 {offsets = [0, 32], sizes = [8, 256], strides = [1, 1]} : vector<8x288xf32> to vector<8x256xf32>
    %12 = vector.extract_strided_slice %4 {offsets = [0, 32], sizes = [8, 256], strides = [1, 1]} : vector<8x288xf32> to vector<8x256xf32>
    %13 = tpu.concatenate %11, %12 in 1 : vector<8x256xf32>, vector<8x256xf32> -> vector<8x512xf32>
    %14 = tpu.concatenate %7, %10, %13, %0 in 0 : vector<8x512xf32>, vector<8x512xf32>, vector<8x512xf32>, vector<1x512xf32> -> vector<25x512xf32>
    %c0_4 = arith.constant 0 : index
    %c0_5 = arith.constant 0 : index
    %15 = vector.load %arg2[%c0_4, %c0_5] : memref<8x25xf32, #tpu.memory_space<vmem>>, vector<8x25xf32>
    %cst_6 = arith.constant dense<0.000000e+00> : vector<8x512xf32>
    %16 = tpu.matmul %15, %14, %cst_6 {dimension_numbers = #tpu.dot_dimension_numbers<[1], [0], [0], [1], [0, 0, 1, 1], [], []>} : vector<8x25xf32>, vector<25x512xf32>, vector<8x512xf32> -> vector<8x512xf32>
    %cst_7 = arith.constant 0.000000e+00 : f32
    %17 = vector.broadcast %cst_7 : f32 to vector<8x2xf32>
    %18 = tpu.concatenate %16, %17 in 1 : vector<8x512xf32>, vector<8x2xf32> -> vector<8x514xf32>
    %19 = vector.extract_strided_slice %18 {offsets = [0, 0], sizes = [8, 512], strides = [1, 1]} : vector<8x514xf32> to vector<8x512xf32>
    %20 = vector.extract_strided_slice %18 {offsets = [0, 1], sizes = [8, 512], strides = [1, 1]} : vector<8x514xf32> to vector<8x512xf32>
    %21 = vector.extract_strided_slice %18 {offsets = [0, 2], sizes = [8, 512], strides = [1, 1]} : vector<8x514xf32> to vector<8x512xf32>
    %22 = tpu.concatenate %19, %20, %21, %0 in 0 : vector<8x512xf32>, vector<8x512xf32>, vector<8x512xf32>, vector<1x512xf32> -> vector<25x512xf32>
    %c0_8 = arith.constant 0 : index
    %c0_9 = arith.constant 0 : index
    %23 = vector.load %arg3[%c0_8, %c0_9] : memref<8x25xf32, #tpu.memory_space<vmem>>, vector<8x25xf32>
    %cst_10 = arith.constant dense<0.000000e+00> : vector<8x512xf32>
    %24 = tpu.matmul %23, %22, %cst_10 {dimension_numbers = #tpu.dot_dimension_numbers<[1], [0], [0], [1], [0, 0, 1, 1], [], []>} : vector<8x25xf32>, vector<25x512xf32>, vector<8x512xf32> -> vector<8x512xf32>
    %25 = vector.extract_strided_slice %24 {offsets = [0, 0], sizes = [8, 256], strides = [1, 1]} : vector<8x512xf32> to vector<8x256xf32>
    %c0_11 = arith.constant 0 : index
    %c0_12 = arith.constant 0 : index
    %c0_13 = arith.constant 0 : index
    %26 = vector.load %arg4[%c0_11, %c0_12, %c0_13] : memref<2x8x256xf32, #tpu.memory_space<vmem>>, vector<1x8x256xf32>
    %27 = vector.shape_cast %26 : vector<1x8x256xf32> to vector<8x256xf32>
    %28 = vector.shape_cast %25 : vector<8x256xf32> to vector<1x8x256xf32>
    tpu.vector_store %arg4[%c0_11, %c0_12, %c0_13], %28 {strides = array<i32>} : memref<2x8x256xf32, #tpu.memory_space<vmem>>, vector<1x8x256xf32>,
    %29 = vector.extract_strided_slice %24 {offsets = [0, 256], sizes = [8, 256], strides = [1, 1]} : vector<8x512xf32> to vector<8x256xf32>
    %c1_14 = arith.constant 1 : index
    %c0_15 = arith.constant 0 : index
    %c0_16 = arith.constant 0 : index
    %30 = vector.load %arg4[%c1_14, %c0_15, %c0_16] : memref<2x8x256xf32, #tpu.memory_space<vmem>>, vector<1x8x256xf32>
    %31 = vector.shape_cast %30 : vector<1x8x256xf32> to vector<8x256xf32>
    %32 = vector.shape_cast %29 : vector<8x256xf32> to vector<1x8x256xf32>
    tpu.vector_store %arg4[%c1_14, %c0_15, %c0_16], %32 {strides = array<i32>} : memref<2x8x256xf32, #tpu.memory_space<vmem>>, vector<1x8x256xf32>,
    return
  }
  func.func @transform_0(%arg0: i32) -> (i32, i32, i32) {
    %c0_i32 = arith.constant 0 : i32
    %c0_i32_0 = arith.constant 0 : i32
    %c0_i32_1 = arith.constant 0 : i32
    %c0_i32_2 = arith.constant 0 : i32
    return %c0_i32, %c0_i32_0, %c0_i32_1 : i32, i32, i32
  }
  func.func @transform_1(%arg0: i32) -> (i32, i32) {
    %c0_i32 = arith.constant 0 : i32
    %c0_i32_0 = arith.constant 0 : i32
    %c0_i32_1 = arith.constant 0 : i32
    return %c0_i32, %c0_i32_0 : i32, i32
  }
  func.func @transform_2(%arg0: i32) -> (i32, i32) {
    %c0_i32 = arith.constant 0 : i32
    %c0_i32_0 = arith.constant 0 : i32
    %c0_i32_1 = arith.constant 0 : i32
    return %c0_i32, %c0_i32_0 : i32, i32
  }
  func.func @transform_3(%arg0: i32) -> (i32, i32, i32) {
    %c0_i32 = arith.constant 0 : i32
    %c0_i32_0 = arith.constant 0 : i32
    %c0_i32_1 = arith.constant 0 : i32
    %c0_i32_2 = arith.constant 0 : i32
    return %c0_i32, %c0_i32_0, %c0_i32_1 : i32, i32, i32
  }
}

</mosaic_0001>

<bundles_post_ra>
// kernel: tpu_custom_call.1
= control target key start
LH: loop header
LB: loop body
LE: loop exit
PB: predicated region body
PF: predicated region fallthrough
CT: control target
= control target key end

     0   :  { %8 = vsyncpa [#allocation3], 0  ;;  %s663_s0 = inlined_call_operand.hbm [shape: f32[2,8,288], index: 0, kind: input, shape index: {}]   ;;  %s664_s1 = inlined_call_operand.hbm [shape: f32[8,25], index: 1, kind: input, shape index: {}]   ;;  %s665_s2 = inlined_call_operand.hbm [shape: f32[8,25], index: 2, kind: input, shape index: {}]   ;;  %s666_s3 = inlined_call_operand.hbm [shape: f32[2,8,256], index: 3, kind: output, shape index: {}]  }
   0x1   :  { %9 = vsyncpa [#allocation6], 0 }
   0x2   :  { %10 = vsyncpa [#allocation4], 0  ;;  %s582_s12 = smov [#allocation5]   ;;  %s583_s14 = smov [#allocation2]  }
   0x3   :  { %s29_s13 = sshll.u32 %s582_s12, 4  ;;  %s16_s15 = sshll.u32 %s583_s14, 4  ;;  %s30_s13 = int_to_ptr.vmem [resolvable:$true] %s29_s13  ;;  %s17_s15 = int_to_ptr.vmem [resolvable:$true] %s16_s15 }
   0x4   :  { %s504_s16 = scalar_lea.vmem %s30_s13, 128  ;;  %p509_p1 = scmp.lt.s32.totalorder %s30_s13, %s30_s13 }
   0x5   :  { %p505_p0 = scmp.ne.s32.totalorder %s30_s13, %s504_s16  ;;  %p510_p2 = scmp.lt.s32.totalorder %s504_s16, %s504_s16 }
   0x7   :  { %p511_p3 = por %p510_p2, %p509_p1 }
   0x9   :  { %p512_p4 = pnand %p511_p3, %p505_p0 }
   0xb   :  { %515 = shalt.err (!%p512_p4)
}
   0xc   :  { %32 = dma.hbm_to_vmem [thread:$0]  %s664_s1, 128, %s30_s13, [#allocation6]  }
   0xd   :  { %s524_s19 = scalar_lea.vmem %s17_s15, 768  ;;  %p529_p6 = scmp.lt.s32.totalorder %s17_s15, %s17_s15 }
   0xe   :  { %p525_p5 = scmp.ne.s32.totalorder %s17_s15, %s524_s19  ;;  %p530_p7 = scmp.lt.s32.totalorder %s524_s19, %s524_s19 }
  0x10   :  { %p531_p8 = por %p530_p7, %p529_p6 }
  0x12   :  { %p532_p9 = pnand %p531_p8, %p525_p5 }
  0x14   :  { %535 = shalt.err (!%p532_p9)
}
  0x15   :  { %s584_s20 = smov 384   ;;  %s585_s21 = smov 24  }
  0x16   :  { %22 = dma.hbm_to_vmem [thread:$0]  %s663_s0, 768, %s17_s15, [#allocation3], %s584_s20, %s584_s20, %s585_s21  }
  0x17   :  { %s586_s24 = smov [#allocation7]  }
  0x18   :  { %s39_s25 = sshll.u32 %s586_s24, 4  ;;  %s40_s25 = int_to_ptr.vmem [resolvable:$true] %s39_s25 }
  0x19   :  { %s544_s26 = scalar_lea.vmem %s40_s25, 128  ;;  %p549_p11 = scmp.lt.s32.totalorder %s40_s25, %s40_s25 }
  0x1a   :  { %p545_p10 = scmp.ne.s32.totalorder %s40_s25, %s544_s26  ;;  %p550_p12 = scmp.lt.s32.totalorder %s544_s26, %s544_s26 }
  0x1c   :  { %p551_p13 = por %p550_p12, %p549_p11 }
  0x1e   :  { %p552_p0 = pnand %p551_p13, %p545_p10 }
  0x20   :  { %555 = shalt.err (!%p552_p0)
}
  0x21   :  { %42 = dma.hbm_to_vmem [thread:$0]  %s665_s2, 128, %s40_s25, [#allocation6]  }
  0x22   :  { %576 = dma.done.wait [#allocation3], 768  }
  0x23   :  { %577 = vsyncadd [#allocation3], 4294966528 }
  0x24   :  { %578 = dma.done.wait [#allocation6], 256  }
  0x25   :  { %579 = vsyncadd [#allocation6], 4294967040  ;;  %vm112_vm0 = vcmask 1040384   ;;  %v587_v0 = vmov 1.0   ;;  %v57_v1 = vld [vmem:[#allocation2 + $0x20] sm:$0xff]  ;;  %v53_v2 = vld [vmem:[#allocation2 + $0x8] sm:$0xff] }
  0x26   :  { %470 = vmatprep.subr.msk.mxu0 %vm112_vm0, %v587_v0  ;;  %473 = vmatprep.subr.msk.mxu1 %vm112_vm0, %v587_v0  ;;  %s588_s0 = smov 96   ;;  %v58_v3 = vld [vmem:[#allocation2 + $0x28] sm:$0xff]  ;;  %v54_v4 = vld [vmem:[#allocation2 + $0x10] sm:$0xff]  ;;  %v56_v5 = vld [vmem:[#allocation2 + $0x18] sm:$0xff]  ;;  %v589_v7 = vmov 0.0   ;;  %s590_s2 = smov 112  }
  0x27   :  { %471 = vmatpush1.msk.msra.mxu0 %vm112_vm0, %v587_v0  ;;  %474 = vmatpush1.msk.msra.mxu1 %vm112_vm0, %v587_v0  ;;  %v52_v6 = vld [vmem:[#allocation2] sm:$0xff]  ;;  %s591_s28 = smov 126   ;;  %vm92_vm1 = vcmask 785408   ;;  %vm68_vm2 = vcmask 916480   ;;  %v107_v28 = vld [vmem:[#allocation5] sm:$0xff]  ;;  %vm108_vm3 = vcmask 203776  }
  0x28   :  { %99 = vrot.lane.b32.xlu1 %v57_v1, %s588_s0  ;;  %88 = vrot.lane.b32.xlu0 %v53_v2, %s588_s0  ;;  %s592_s29 = smov 127   ;;  %vm292_vm4 = vcmask 1031168   ;;  %vm273_vm5 = vcmask 1039360   ;;  %v301_v48 = vld [vmem:[#allocation7] sm:$0xff]  ;;  %s593_s30 = smov [#allocation8]  }
  0x29   :  { %180 = vmatprep.mubr.f32.mxu0 %v589_v7  ;;  %251 = vmatprep.mubr.f32.mxu1 %v589_v7  ;;  %s457_s4 = sshll.u32 %s593_s30, 4  ;;  %s458_s4 = int_to_ptr.vmem [resolvable:$true] %s457_s4 }
  0x2a   :  { %s556_s5 = scalar_lea.vmem %s458_s4, 512  ;;  %p561_p2 = scmp.lt.s32.totalorder %s458_s4, %s458_s4 }
  0x2b   :  { %p557_p1 = scmp.ne.s32.totalorder %s458_s4, %s556_s5  ;;  %p562_p3 = scmp.lt.s32.totalorder %s556_s5, %s556_s5 }
  0x2c   :  { %101 = vrot.lane.b32.xlu1 %v58_v3, %s588_s0  ;;  %90 = vrot.lane.b32.xlu0 %v54_v4, %s588_s0 }
  0x2d   :  { %p563_p4 = por %p562_p3, %p561_p2 }
  0x2f   :  { %p564_p5 = pnand %p563_p4, %p557_p1 }
  0x30   :  { %97 = vrot.lane.b32.xlu1 %v56_v5, %s588_s0  ;;  %86 = vrot.lane.b32.xlu0 %v52_v6, %s588_s0 }
  0x34   :  { %66 = vrot.lane.b32.xlu1 %v54_v4, %s590_s2  ;;  %64 = vrot.lane.b32.xlu0 %v53_v2, %s590_s2 }
  0x38   :  { %80 = vrot.lane.b32.xlu1 %v58_v3, %s590_s2  ;;  %78 = vrot.lane.b32.xlu0 %v57_v1, %s590_s2 }
  0x3c   :  { %76 = vrot.lane.b32.xlu1 %v56_v5, %s590_s2  ;;  %62 = vrot.lane.b32.xlu0 %v52_v6, %s590_s2 }
  0x40   :  { %290 = vrot.lane.b32.xlu1 %v589_v7, %s591_s28 }
  0x9a   :  { %v100_v8 = vpop.permute.xlu1 %99  ;;  %v89_v9 = vpop.permute.xlu0 %88 }
  0x9e   :  { %v102_v10 = vpop.permute.xlu1 %101  ;;  %v91_v11 = vpop.permute.xlu0 %90 }
  0x9f   :  { %v94_v12 = vsel %vm92_vm1, %v89_v9, %v91_v11  ;;  %v104_v13 = vsel %vm92_vm1, %v100_v8, %v102_v10 }
  0xa0   :  { %142 = vmatprep.subr.mxu0 %v94_v12  ;;  %213 = vmatprep.subr.mxu1 %v104_v13 }
  0xa2   :  { %v98_v14 = vpop.permute.xlu1 %97  ;;  %v87_v15 = vpop.permute.xlu0 %86 }
  0xa3   :  { %v93_v16 = vsel %vm92_vm1, %v87_v15, %v89_v9  ;;  %v103_v17 = vsel %vm92_vm1, %v98_v14, %v100_v8 }
  0xa4   :  { %143 = vmatpush1.msra.mxu0 %v93_v16  ;;  %214 = vmatpush1.msra.mxu1 %v103_v17 }
  0xa6   :  { %v67_v18 = vpop.permute.xlu1 %66  ;;  %v65_v19 = vpop.permute.xlu0 %64 }
  0xa7   :  { %v70_v20 = vsel %vm68_vm2, %v65_v19, %v67_v18 }
  0xa8   :  { %144 = vmatprep.subr.mxu0 %v70_v20 }
  0xaa   :  { %v81_v21 = vpop.permute.xlu1 %80  ;;  %v79_v22 = vpop.permute.xlu0 %78 }
  0xab   :  { %v83_v23 = vsel %vm68_vm2, %v79_v22, %v81_v21 }
  0xac   :  { %215 = vmatprep.subr.mxu1 %v83_v23 }
  0xae   :  { %v77_v24 = vpop.permute.xlu1 %76  ;;  %v63_v25 = vpop.permute.xlu0 %62 }
  0xaf   :  { %v69_v26 = vsel %vm68_vm2, %v63_v25, %v65_v19  ;;  %v82_v27 = vsel %vm68_vm2, %v77_v24, %v79_v22 }
  0xb0   :  { %145 = vmatpush1.msra.mxu0 %v69_v26  ;;  %216 = vmatpush1.msra.mxu1 %v82_v27 }
  0xb1   :  { %146 = vmatprep.subr.mxu0 %v53_v2  ;;  %217 = vmatprep.subr.mxu1 %v57_v1 }
  0xb2   :  { %147 = vmatpush1.msra.mxu0 %v52_v6  ;;  %218 = vmatpush1.msra.mxu1 %v56_v5  ;;  %v291_v33 = vpop.permute.xlu1 %290 }
  0xb3   :  { %472 = vmatmul.mubr.msk.f32.vlgmr.msra.gmra.mxu0 %vm108_vm3, %v107_v28  ;;  %475 = vmatmul.mubr.msk.f32.vlgmr.msra.gmra.mxu1 %vm108_vm3, %v107_v28 }
  0xb4   :  { %476 = vmatprep.subr.msk.mxu0 %vm112_vm0, %v587_v0  ;;  %479 = vmatprep.subr.msk.mxu1 %vm112_vm0, %v587_v0 }
  0xb5   :  { %477 = vmatpush1.msk.msra.mxu0 %vm112_vm0, %v587_v0  ;;  %480 = vmatpush1.msk.msra.mxu1 %vm112_vm0, %v587_v0 }
  0xb6   :  { %369 = vmatprep.mubr.f32.mxu0 %v589_v7  ;;  %440 = vmatprep.mubr.f32.mxu1 %v589_v7 }
 0x173   :  { %v182_v29 = vpop.f32.mrf.mxu0  ;;  %v253_v30 = vpop.f32.mrf.mxu1 }
 0x174   :  { %286 = vrot.lane.b32.xlu1 %v253_v30, %s591_s28  ;;  %282 = vrot.lane.b32.xlu0 %v182_v29, %s591_s28 }
 0x175   :  { %v184_v31 = vpop.f32.mrf.mxu0  ;;  %v255_v32 = vpop.f32.mrf.mxu1 }
 0x178   :  { %267 = vrot.lane.b32.xlu0 %v253_v30, %s592_s29  ;;  %265 = vrot.lane.b32.xlu1 %v184_v31, %s592_s29 }
 0x17c   :  { %269 = vrot.lane.b32.xlu1 %v255_v32, %s592_s29  ;;  %284 = vrot.lane.b32.xlu0 %v184_v31, %s591_s28 }
 0x180   :  { %263 = vrot.lane.b32.xlu1 %v182_v29, %s592_s29  ;;  %288 = vrot.lane.b32.xlu0 %v255_v32, %s591_s28 }
 0x184   :  { %271 = vrot.lane.b32.xlu0 %v589_v7, %s592_s29 }
 0x1e6   :  { %v287_v34 = vpop.permute.xlu1 %286  ;;  %v283_v35 = vpop.permute.xlu0 %282 }
 0x1ea   :  { %v268_v36 = vpop.permute.xlu0 %267  ;;  %v266_v37 = vpop.permute.xlu1 %265 }
 0x1eb   :  { %v275_v42 = vsel %vm273_vm5, %v266_v37, %v268_v36 }
 0x1ee   :  { %v270_v38 = vpop.permute.xlu1 %269  ;;  %v285_v39 = vpop.permute.xlu0 %284 }
 0x1ef   :  { %v293_v40 = vsel %vm292_vm4, %v283_v35, %v285_v39  ;;  %v294_v41 = vsel %vm292_vm4, %v285_v39, %v287_v34  ;;  %v276_v51 = vsel %vm273_vm5, %v268_v36, %v270_v38 }
 0x1f0   :  { %331 = vmatprep.subr.mxu0 %v294_v41 }
 0x1f1   :  { %332 = vmatpush1.msra.mxu0 %v293_v40 }
 0x1f2   :  { %v264_v43 = vpop.permute.xlu1 %263  ;;  %333 = vmatprep.subr.mxu0 %v275_v42  ;;  %v289_v44 = vpop.permute.xlu0 %288 }
 0x1f3   :  { %v274_v45 = vsel %vm273_vm5, %v264_v43, %v266_v37  ;;  %v295_v46 = vsel %vm292_vm4, %v287_v34, %v289_v44  ;;  %v296_v47 = vsel %vm292_vm4, %v289_v44, %v291_v33 }
 0x1f4   :  { %334 = vmatpush1.msra.mxu0 %v274_v45  ;;  %402 = vmatprep.subr.mxu1 %v296_v47 }
 0x1f5   :  { %335 = vmatprep.subr.mxu0 %v184_v31  ;;  %403 = vmatpush1.msra.mxu1 %v295_v46 }
 0x1f6   :  { %336 = vmatpush1.msra.mxu0 %v182_v29  ;;  %v272_v49 = vpop.permute.xlu0 %271 }
 0x1f7   :  { %v277_v50 = vsel %vm273_vm5, %v270_v38, %v272_v49  ;;  %478 = vmatmul.mubr.msk.f32.vlgmr.msra.gmra.mxu0 %vm108_vm3, %v301_v48 }
 0x1f8   :  { %404 = vmatprep.subr.mxu1 %v277_v50 }
 0x1f9   :  { %405 = vmatpush1.msra.mxu1 %v276_v51 }
 0x1fa   :  { %406 = vmatprep.subr.mxu1 %v255_v32 }
 0x1fb   :  { %407 = vmatpush1.msra.mxu1 %v253_v30 }
 0x1fc   :  { %481 = vmatmul.mubr.msk.f32.vlgmr.msra.gmra.mxu1 %vm108_vm3, %v301_v48 }
 0x2b7   :  { %v371_v52 = vpop.f32.mrf.mxu0 }
 0x2b8   :  { %447 = vst [vmem:[#allocation8] sm:$0xff] %v371_v52 }
 0x2b9   :  { %v373_v53 = vpop.f32.mrf.mxu0 }
 0x2ba   :  { %448 = vst [vmem:[#allocation8 + $0x8] sm:$0xff] %v373_v53 }
 0x2bc   :  { %v442_v54 = vpop.f32.mrf.mxu1 }
 0x2bd   :  { %450 = vst [vmem:[#allocation8 + $0x10] sm:$0xff] %v442_v54 }
 0x2be   :  { %v444_v55 = vpop.f32.mrf.mxu1 }
 0x2bf   :  { %451 = vst [vmem:[#allocation8 + $0x18] sm:$0xff] %v444_v55 }
 0x2c0   :  { %567 = shalt.err (!%p564_p5)
}
 0x2c1   :  { %s594_s6 = smov 256   ;;  %s595_s7 = smov 16  }
 0x2c2   :  { %463 = dma.vmem_to_hbm [thread:$0]  %s458_s4, 512, %s666_s3, [#allocation4], %s594_s6, %s594_s6, %s595_s7  }
 0x2c3   :  { %580 = dma.done.wait [#allocation4], 512  }
 0x2c4   :  { %581 = vsyncadd [#allocation4], 4294966784 }
 0x2c5   :  { %467 = vsyncpa [#allocation3], 1 }
 0x2c6   :  { %468 = vsyncpa [#allocation6], 1 }
 0x2c7   :  { %469 = vsyncpa [#allocation4], 1 }

</bundles_post_ra>
